<compile_context>
chip_gen: v7x
topology: tpu7x:2x2x1
jax: 0.10.0
libtpu: 0.0.40
codegen_flags: <defaults>
</compile_context>

<pallas_src>
import functools
import math

import jax
import jax.numpy as jnp
from jax.experimental import pallas as pl
from jax.experimental.pallas import tpu as pltpu

BN_EPS = 1e-5
_LANES = 128  # TPU lane width


def _round_up(n, m):
    return ((n + m - 1) // m) * m


def _lane_pad(n):
    return _round_up(max(n, 1), _LANES)


def _student_mlp_kernel(x_ref, w1_ref, w2_ref, vec_ref, out_ref,
                        h1_buf, h2_buf, stats_ref, *,
                        batch, tile_rows, h1, h2, need_mask):
    """Fused forward over a (phase, batch-tile) grid.

    vec_ref rows (lane-padded):
      0: b1   1: gamma1   2: beta1   3: b2   4: gamma2   5: beta2
      6: [b3, 0, ...]     7: unused
      8 .. 8+h2-1 : w3 stored as a column in lane 0 (head weights)

    stats_ref rows: 0 sum1, 1 sumsq1, 2 sum2, 3 sumsq2, 4 scale1, 5 shift1,
                    6 scale2, 7 shift2.
    """
    p = pl.program_id(0)
    t = pl.program_id(1)
    row0 = pl.multiple_of(t * tile_rows, 8)
    inv_n = 1.0 / batch  # true batch size (static), NOT padded

    def masked(h):
        # Zero out pad rows so they never pollute the batch statistics.
        if not need_mask:
            return h
        rows = jax.lax.broadcasted_iota(jnp.int32, (tile_rows, 1), 0) + t * tile_rows
        return h * (rows < batch).astype(h.dtype)

    # ---------------- phase 0: layer1 + ReLU, stash h1, accumulate stats ----------------
    @pl.when(p == 0)
    def _():
        @pl.when(t == 0)
        def _():
            stats_ref[...] = jnp.zeros_like(stats_ref)

        b1 = vec_ref[0:1, :h1]
        a = jnp.maximum(
            jnp.dot(x_ref[...], w1_ref[...], preferred_element_type=jnp.float32) + b1,
            0.0)
        h1_buf[pl.ds(row0, tile_rows), :] = a
        am = masked(a)
        stats_ref[0:1, :h1] = stats_ref[0:1, :h1] + jnp.sum(am, axis=0, keepdims=True)
        stats_ref[1:2, :h1] = stats_ref[1:2, :h1] + jnp.sum(am * am, axis=0, keepdims=True)

    # ---------------- phase 1: BN1 (global stats) -> layer2 + ReLU, stash h2 ------------
    @pl.when(p == 1)
    def _():
        @pl.when(t == 0)
        def _():
            mean = stats_ref[0:1, :] * inv_n
            var = stats_ref[1:2, :] * inv_n - mean * mean          # single-pass variance
            scale = vec_ref[1:2, :] * jax.lax.rsqrt(var + BN_EPS)  # EUP rsqrt
            stats_ref[4:5, :] = scale
            stats_ref[5:6, :] = vec_ref[2:3, :] - mean * scale     # folded BN affine

        a = h1_buf[pl.ds(row0, tile_rows), :]
        a = a * stats_ref[4:5, :h1] + stats_ref[5:6, :h1]
        b2 = vec_ref[3:4, :h2]
        z = jnp.maximum(
            jnp.dot(a, w2_ref[...], preferred_element_type=jnp.float32) + b2, 0.0)
        h2_buf[pl.ds(row0, tile_rows), :] = z
        zm = masked(z)
        stats_ref[2:3, :h2] = stats_ref[2:3, :h2] + jnp.sum(zm, axis=0, keepdims=True)
        stats_ref[3:4, :h2] = stats_ref[3:4, :h2] + jnp.sum(zm * zm, axis=0, keepdims=True)

    # ---------------- phase 2: BN2 (global stats) -> head, lane-dense store -------------
    @pl.when(p == 2)
    def _():
        @pl.when(t == 0)
        def _():
            mean = stats_ref[2:3, :] * inv_n
            var = stats_ref[3:4, :] * inv_n - mean * mean
            scale = vec_ref[4:5, :] * jax.lax.rsqrt(var + BN_EPS)
            stats_ref[6:7, :] = scale
            stats_ref[7:8, :] = vec_ref[5:6, :] - mean * scale

        z = h2_buf[pl.ds(row0, tile_rows), :]
        z = z * stats_ref[6:7, :h2] + stats_ref[7:8, :h2]
        b3 = vec_ref[6:7, 0:1]                    # (1, 1)
        w3c = vec_ref[8:8 + h2, 0:1]              # (h2, 1) head weights as a column

        # Head Linear(h2 -> 1) on VPU (multiply) + XLU (sublane reduce); results land
        # lane-dense (128 rows per 128-lane output row), no 128x broadcast.
        n_out_rows = max(tile_rows // _LANES, 1)
        chunk = tile_rows // n_out_rows
        for r in range(n_out_rows):               # static, <= a few iterations
            zc = z[r * chunk:(r + 1) * chunk, :]                      # (chunk, h2)
            yr = jnp.sum(zc.T * w3c, axis=0, keepdims=True) + b3      # (1, chunk)
            out_ref[0:1, r:r + 1, 0:chunk] = yr[:, None, :]


def pack_params(params):
    """Pack the small vectors into one slab; call ONCE at init (hoisted out of forward).

    Returns (w1, w2, vec) where vec is (8 + round_up(h2, 8), lanes) f32.
    """
    (w1, b1, g1, be1, w2, b2, g2, be2, w3, b3) = params
    h1, h2 = w1.shape[1], w2.shape[1]
    lanes = _lane_pad(max(h1, h2))

    def row(v):
        v = jnp.asarray(v, jnp.float32).reshape(1, -1)
        return jnp.pad(v, ((0, 0), (0, lanes - v.shape[1])))

    top = jnp.concatenate(
        [row(b1), row(g1), row(be1), row(b2), row(g2), row(be2), row(b3),
         jnp.zeros((1, lanes), jnp.float32)], axis=0)                    # (8, lanes)
    w3_rows = _round_up(h2, 8)
    col = jnp.pad(jnp.asarray(w3, jnp.float32).reshape(-1, 1),
                  ((0, w3_rows - h2), (0, lanes - 1)))                   # (w3_rows, lanes)
    vec = jnp.concatenate([top, col], axis=0)
    return jnp.asarray(w1, jnp.float32), jnp.asarray(w2, jnp.float32), vec


def student_forward(x, w1, w2, vec, *, tile_rows=None):
    """Fused forward; returns (batch, 1) like the PyTorch module (training-mode BN)."""
    batch, input_dim = x.shape
    h1, h2 = w1.shape[1], w2.shape[1]

    # --- pick / validate the batch tile ---
    if tile_rows is None:
        if batch <= _LANES:
            tile_rows = _round_up(batch, 8)
        else:
            tile_rows = min(512, _round_up(batch, _LANES))
    if tile_rows > _LANES:
        assert tile_rows % _LANES == 0, "tile_rows > 128 must be a multiple of 128"
    else:
        assert tile_rows % 8 == 0, "tile_rows must be a multiple of 8"

    padded = _round_up(batch, tile_rows)
    num_tiles = padded // tile_rows
    need_mask = padded != batch
    if need_mask:
        x = jnp.pad(x, ((0, padded - batch), (0, 0)))
    out_rows = max(tile_rows // _LANES, 1)
    lanes = vec.shape[1]

    # --- VMEM budget (activations are VMEM-resident across phases) ---
    act_bytes = 4 * padded * (_lane_pad(h1) + _lane_pad(h2))
    fixed_bytes = 4 * (w1.size + w2.size + (vec.shape[0] + 8) * lanes)
    tile_io_bytes = 4 * 2 * (tile_rows * _lane_pad(input_dim) + out_rows * _LANES)
    work_bytes = 4 * 6 * tile_rows * _lane_pad(max(h1, h2))
    est = act_bytes + fixed_bytes + tile_io_bytes + work_bytes
    assert est < 40 * 2**20, (
        "batch too large for VMEM-resident activations; stream h1/h2 through HBM")
    vmem_limit = int(min(56 * 2**20, max(16 * 2**20, 2 * est)))

    cost = pl.CostEstimate(
        flops=2 * batch * (input_dim * h1 + h1 * h2 + h2) + 12 * batch * (h1 + h2),
        transcendentals=h1 + h2,  # rsqrt per BN feature
        bytes_accessed=4 * (x.size + w1.size + w2.size + vec.size
                            + num_tiles * out_rows * _LANES),
    )

    kernel = functools.partial(
        _student_mlp_kernel, batch=batch, tile_rows=tile_rows,
        h1=h1, h2=h2, need_mask=need_mask)

    grid_spec = pltpu.PrefetchScalarGridSpec(
        num_scalar_prefetch=0,
        grid=(3, num_tiles),  # (phase, batch tile); phase outermost
        in_specs=[
            pl.BlockSpec((tile_rows, input_dim), lambda p, t: (t, 0)),
            pl.BlockSpec(w1.shape, lambda p, t: (0, 0)),   # resident: constant index map
            pl.BlockSpec(w2.shape, lambda p, t: (0, 0)),   # resident
            pl.BlockSpec(vec.shape, lambda p, t: (0, 0)),  # resident
        ],
        out_specs=pl.BlockSpec((1, out_rows, _LANES), lambda p, t: (t, 0, 0)),
        scratch_shapes=[
            pltpu.VMEM((padded, h1), jnp.float32),   # stashed layer-1 activations
            pltpu.VMEM((padded, h2), jnp.float32),   # stashed layer-2 activations
            pltpu.VMEM((8, lanes), jnp.float32),     # BN sums / folded scale+shift
        ],
    )

    out = pl.pallas_call(
        kernel,
        out_shape=jax.ShapeDtypeStruct((num_tiles, out_rows, _LANES), jnp.float32),
        grid_spec=grid_spec,
        compiler_params=pltpu.CompilerParams(
            # Both axes are sequential: stats accumulation + phase ordering.
            dimension_semantics=("arbitrary", "arbitrary"),
            vmem_limit_bytes=vmem_limit),
        cost_estimate=cost,
    )(x, w1, w2, vec)

    y = out.reshape(num_tiles, out_rows * _LANES)[:, :tile_rows].reshape(-1)[:batch]
    return y.reshape(batch, 1)


def init_params(key, input_dim, hidden_sizes):
    """Deterministic init mimicking PyTorch defaults (U(+-1/sqrt(fan_in)); BN gamma=1, beta=0)."""
    params = []
    dims = [input_dim] + list(hidden_sizes)
    for i in range(len(hidden_sizes)):
        fan_in, fan_out = dims[i], dims[i + 1]
        key, kw, kb = jax.random.split(key, 3)
        bound = 1.0 / math.sqrt(fan_in)
        w = jax.random.uniform(kw, (fan_in, fan_out), jnp.float32, -bound, bound)
        b = jax.random.uniform(kb, (1, fan_out), jnp.float32, -bound, bound)
        gamma = jnp.ones((1, fan_out), jnp.float32)
        beta = jnp.zeros((1, fan_out), jnp.float32)
        params += [w, b, gamma, beta]
    fan_in = dims[-1]
    key, kw, kb = jax.random.split(key, 3)
    bound = 1.0 / math.sqrt(fan_in)
    w3 = jax.random.uniform(kw, (fan_in, 1), jnp.float32, -bound, bound)
    b3 = jax.random.uniform(kb, (1, 1), jnp.float32, -bound, bound)
    params += [w3, b3]
    return tuple(params)


def reference_forward(x, params):
    """Pure-JAX reference of the same forward pass (training-mode BatchNorm1d)."""
    (w1, b1, g1, be1, w2, b2, g2, be2, w3, b3) = params

    def block(h, w, b, g, be):
        h = jnp.maximum(h @ w + b, 0.0)
        m = jnp.mean(h, axis=0, keepdims=True)
        v = jnp.mean((h - m) ** 2, axis=0, keepdims=True)
        return (h - m) / jnp.sqrt(v + BN_EPS) * g + be

    h = block(x, w1, b1, g1, be1)
    h = block(h, w2, b2, g2, be2)
    return h @ w3 + b3


if __name__ == "__main__":
    key = jax.random.PRNGKey(0)
    input_dim, hidden_sizes = 16, [32, 32]

    key, kx, kp = jax.random.split(key, 3)
    params = init_params(kp, input_dim, hidden_sizes)
    w1, w2, vec = pack_params(params)  # packed ONCE, hoisted out of the forward path

    # Case 1: small batch, single tile (whole batch resident in one grid tile).
    x = jax.random.normal(kx, (8, input_dim), jnp.float32)
    out = jax.block_until_ready(student_forward(x, w1, w2, vec))
    ref = reference_forward(x, params)
    assert out.shape == (8, 1), out.shape
    assert jnp.allclose(out, ref, atol=1e-4, rtol=1e-4), (out, ref)

    # Case 2: multi-tile batch grid with global-batch BN stats and a ragged last tile
    # (exercises the 3-phase accumulation + row masking).
    key, kx2 = jax.random.split(key)
    x2 = jax.random.normal(kx2, (20, input_dim), jnp.float32)
    out2 = jax.block_until_ready(student_forward(x2, w1, w2, vec, tile_rows=8))
    ref2 = reference_forward(x2, params)
    assert out2.shape == (20, 1), out2.shape
    assert jnp.allclose(out2, ref2, atol=1e-4, rtol=1e-4), (out2, ref2)

    print("KERNEL_OK")
</pallas_src>

<mosaic_0001>
module attributes {stable_mosaic.version = 11 : i64} {
  func.func @_student_mlp_kernel(%arg0: i32, %arg1: i32, %arg2: memref<8x16xf32, #tpu.memory_space<vmem>>, %arg3: memref<16x32xf32, #tpu.memory_space<vmem>>, %arg4: memref<32x32xf32, #tpu.memory_space<vmem>>, %arg5: memref<40x128xf32, #tpu.memory_space<vmem>>, %arg6: memref<1x1x128xf32, #tpu.memory_space<vmem>>, %arg7: memref<8x32xf32, #tpu.memory_space<vmem>>, %arg8: memref<8x32xf32, #tpu.memory_space<vmem>>, %arg9: memref<8x128xf32, #tpu.memory_space<vmem>>) attributes {dimension_semantics = [#tpu.dimension_semantics<arbitrary>, #tpu.dimension_semantics<arbitrary>], iteration_bounds = array<i64: 3, 1>, scalar_prefetch = 0 : i64, scratch_operands = 3 : i64, tpu.core_type = #tpu.core_type<tc>, window_params = [{transform_indices = @transform_0, window_bounds = array<i64: 8, 16>}, {pipeline_mode = #tpu.pipeline_mode<synchronous>, transform_indices = @transform_1, window_bounds = array<i64: 16, 32>}, {pipeline_mode = #tpu.pipeline_mode<synchronous>, transform_indices = @transform_2, window_bounds = array<i64: 32, 32>}, {pipeline_mode = #tpu.pipeline_mode<synchronous>, transform_indices = @transform_3, window_bounds = array<i64: 40, 128>}, {transform_indices = @transform_4, window_bounds = array<i64: 1, 1, 128>}]} {
    %c8_i32 = arith.constant 8 : i32
    %0 = arith.muli %arg1, %c8_i32 : i32
    %1 = tpu.assume_multiple %0, 8 : i32
    %c0_i32 = arith.constant 0 : i32
    %2 = arith.cmpi eq, %arg0, %c0_i32 : i32
    %3 = arith.extui %2 : i1 to i32
    %c0_i32_0 = arith.constant 0 : i32
    %4 = arith.cmpi ne, %3, %c0_i32_0 : i32
    scf.if %4 {
      %c0_i32_3 = arith.constant 0 : i32
      %11 = arith.cmpi eq, %arg1, %c0_i32_3 : i32
      %12 = arith.extui %11 : i1 to i32
      %c0_i32_4 = arith.constant 0 : i32
      %13 = arith.cmpi ne, %12, %c0_i32_4 : i32
      scf.if %13 {
        %cst_21 = arith.constant 0.000000e+00 : f32
        %35 = vector.broadcast %cst_21 : f32 to vector<8x128xf32>
        %c0_22 = arith.constant 0 : index
        %c0_23 = arith.constant 0 : index
        %36 = vector.load %arg9[%c0_22, %c0_23] : memref<8x128xf32, #tpu.memory_space<vmem>>, vector<8x128xf32>
        tpu.vector_store %arg9[%c0_22, %c0_23], %35 {strides = array<i32>} : memref<8x128xf32, #tpu.memory_space<vmem>>, vector<8x128xf32>,
      } else {
      }
      %c0 = arith.constant 0 : index
      %c0_5 = arith.constant 0 : index
      %14 = vector.load %arg5[%c0, %c0_5] : memref<40x128xf32, #tpu.memory_space<vmem>>, vector<1x32xf32>
      %c0_6 = arith.constant 0 : index
      %c0_7 = arith.constant 0 : index
      %15 = vector.load %arg2[%c0_6, %c0_7] : memref<8x16xf32, #tpu.memory_space<vmem>>, vector<8x16xf32>
      %c0_8 = arith.constant 0 : index
      %c0_9 = arith.constant 0 : index
      %16 = vector.load %arg3[%c0_8, %c0_9] : memref<16x32xf32, #tpu.memory_space<vmem>>, vector<16x32xf32>
      %cst = arith.constant dense<0.000000e+00> : vector<8x32xf32>
      %17 = tpu.matmul %15, %16, %cst {dimension_numbers = #tpu.dot_dimension_numbers<[1], [0], [0], [1], [0, 0, 1, 1], [], []>} : vector<8x16xf32>, vector<16x32xf32>, vector<8x32xf32> -> vector<8x32xf32>
      %18 = vector.broadcast %14 : vector<1x32xf32> to vector<8x32xf32>
      %19 = arith.addf %17, %18 : vector<8x32xf32>
      %cst_10 = arith.constant 0.000000e+00 : f32
      %20 = vector.broadcast %cst_10 : f32 to vector<8x32xf32>
      %21 = arith.maximumf %19, %20 : vector<8x32xf32>
      %22 = arith.index_cast %1 : i32 to index
      %c0_11 = arith.constant 0 : index
      %23 = vector.load %arg7[%22, %c0_11] : memref<8x32xf32, #tpu.memory_space<vmem>>, vector<8x32xf32>
      tpu.vector_store %arg7[%22, %c0_11], %21 {strides = array<i32>} : memref<8x32xf32, #tpu.memory_space<vmem>>, vector<8x32xf32>,
      %c0_12 = arith.constant 0 : index
      %c0_13 = arith.constant 0 : index
      %24 = vector.load %arg9[%c0_12, %c0_13] : memref<8x128xf32, #tpu.memory_space<vmem>>, vector<1x32xf32>
      %cst_14 = arith.constant dense<0.000000e+00> : vector<32xf32>
      %25 = vector.multi_reduction <add>, %21, %cst_14 [0] : vector<8x32xf32> to vector<32xf32>
      %26 = vector.shape_cast %25 : vector<32xf32> to vector<1x32xf32>
      %27 = arith.addf %24, %26 : vector<1x32xf32>
      %c0_15 = arith.constant 0 : index
      %c0_16 = arith.constant 0 : index
      %28 = vector.load %arg9[%c0_15, %c0_16] : memref<8x128xf32, #tpu.memory_space<vmem>>, vector<1x32xf32>
      tpu.vector_store %arg9[%c0_15, %c0_16], %27 {strides = array<i32>} : memref<8x128xf32, #tpu.memory_space<vmem>>, vector<1x32xf32>,
      %c1 = arith.constant 1 : index
      %c0_17 = arith.constant 0 : index
      %29 = vector.load %arg9[%c1, %c0_17] : memref<8x128xf32, #tpu.memory_space<vmem>>, vector<1x32xf32>
      %30 = arith.mulf %21, %21 : vector<8x32xf32>
      %cst_18 = arith.constant dense<0.000000e+00> : vector<32xf32>
      %31 = vector.multi_reduction <add>, %30, %cst_18 [0] : vector<8x32xf32> to vector<32xf32>
      %32 = vector.shape_cast %31 : vector<32xf32> to vector<1x32xf32>
      %33 = arith.addf %29, %32 : vector<1x32xf32>
      %c1_19 = arith.constant 1 : index
      %c0_20 = arith.constant 0 : index
      %34 = vector.load %arg9[%c1_19, %c0_20] : memref<8x128xf32, #tpu.memory_space<vmem>>, vector<1x32xf32>
      tpu.vector_store %arg9[%c1_19, %c0_20], %33 {strides = array<i32>} : memref<8x128xf32, #tpu.memory_space<vmem>>, vector<1x32xf32>,
    } else {
    }
    %c1_i32 = arith.constant 1 : i32
    %5 = arith.cmpi eq, %arg0, %c1_i32 : i32
    %6 = arith.extui %5 : i1 to i32
    %c0_i32_1 = arith.constant 0 : i32
    %7 = arith.cmpi ne, %6, %c0_i32_1 : i32
    scf.if %7 {
      %c0_i32_3 = arith.constant 0 : i32
      %11 = arith.cmpi eq, %arg1, %c0_i32_3 : i32
      %12 = arith.extui %11 : i1 to i32
      %c0_i32_4 = arith.constant 0 : i32
      %13 = arith.cmpi ne, %12, %c0_i32_4 : i32
      scf.if %13 {
        %c0_21 = arith.constant 0 : index
        %c0_22 = arith.constant 0 : index
        %42 = vector.load %arg9[%c0_21, %c0_22] : memref<8x128xf32, #tpu.memory_space<vmem>>, vector<1x128xf32>
        %cst_23 = arith.constant 1.250000e-01 : f32
        %43 = vector.broadcast %cst_23 : f32 to vector<1x128xf32>
        %44 = arith.mulf %42, %43 : vector<1x128xf32>
        %c1 = arith.constant 1 : index
        %c0_24 = arith.constant 0 : index
        %45 = vector.load %arg9[%c1, %c0_24] : memref<8x128xf32, #tpu.memory_space<vmem>>, vector<1x128xf32>
        %cst_25 = arith.constant 1.250000e-01 : f32
        %46 = vector.broadcast %cst_25 : f32 to vector<1x128xf32>
        %47 = arith.mulf %45, %46 : vector<1x128xf32>
        %48 = arith.mulf %44, %44 : vector<1x128xf32>
        %49 = arith.subf %47, %48 : vector<1x128xf32>
        %c1_26 = arith.constant 1 : index
        %c0_27 = arith.constant 0 : index
        %50 = vector.load %arg5[%c1_26, %c0_27] : memref<40x128xf32, #tpu.memory_space<vmem>>, vector<1x128xf32>
        %cst_28 = arith.constant 9.99999974E-6 : f32
        %51 = vector.broadcast %cst_28 : f32 to vector<1x128xf32>
        %52 = arith.addf %49, %51 : vector<1x128xf32>
        %53 = math.rsqrt %52 : vector<1x128xf32>
        %54 = arith.mulf %50, %53 : vector<1x128xf32>
        %c4_29 = arith.constant 4 : index
        %c0_30 = arith.constant 0 : index
        %55 = vector.load %arg9[%c4_29, %c0_30] : memref<8x128xf32, #tpu.memory_space<vmem>>, vector<1x128xf32>
        tpu.vector_store %arg9[%c4_29, %c0_30], %54 {strides = array<i32>} : memref<8x128xf32, #tpu.memory_space<vmem>>, vector<1x128xf32>,
        %c2_31 = arith.constant 2 : index
        %c0_32 = arith.constant 0 : index
        %56 = vector.load %arg5[%c2_31, %c0_32] : memref<40x128xf32, #tpu.memory_space<vmem>>, vector<1x128xf32>
        %57 = arith.mulf %44, %54 : vector<1x128xf32>
        %58 = arith.subf %56, %57 : vector<1x128xf32>
        %c5_33 = arith.constant 5 : index
        %c0_34 = arith.constant 0 : index
        %59 = vector.load %arg9[%c5_33, %c0_34] : memref<8x128xf32, #tpu.memory_space<vmem>>, vector<1x128xf32>
        tpu.vector_store %arg9[%c5_33, %c0_34], %58 {strides = array<i32>} : memref<8x128xf32, #tpu.memory_space<vmem>>, vector<1x128xf32>,
      } else {
      }
      %14 = arith.index_cast %1 : i32 to index
      %c0 = arith.constant 0 : index
      %15 = vector.load %arg7[%14, %c0] : memref<8x32xf32, #tpu.memory_space<vmem>>, vector<8x32xf32>
      %c4 = arith.constant 4 : index
      %c0_5 = arith.constant 0 : index
      %16 = vector.load %arg9[%c4, %c0_5] : memref<8x128xf32, #tpu.memory_space<vmem>>, vector<1x32xf32>
      %17 = vector.broadcast %16 : vector<1x32xf32> to vector<8x32xf32>
      %18 = arith.mulf %15, %17 : vector<8x32xf32>
      %c5 = arith.constant 5 : index
      %c0_6 = arith.constant 0 : index
      %19 = vector.load %arg9[%c5, %c0_6] : memref<8x128xf32, #tpu.memory_space<vmem>>, vector<1x32xf32>
      %20 = vector.broadcast %19 : vector<1x32xf32> to vector<8x32xf32>
      %21 = arith.addf %18, %20 : vector<8x32xf32>
      %c3 = arith.constant 3 : index
      %c0_7 = arith.constant 0 : index
      %22 = vector.load %arg5[%c3, %c0_7] : memref<40x128xf32, #tpu.memory_space<vmem>>, vector<1x32xf32>
      %c0_8 = arith.constant 0 : index
      %c0_9 = arith.constant 0 : index
      %23 = vector.load %arg4[%c0_8, %c0_9] : memref<32x32xf32, #tpu.memory_space<vmem>>, vector<32x32xf32>
      %cst = arith.constant dense<0.000000e+00> : vector<8x32xf32>
      %24 = tpu.matmul %21, %23, %cst {dimension_numbers = #tpu.dot_dimension_numbers<[1], [0], [0], [1], [0, 0, 1, 1], [], []>} : vector<8x32xf32>, vector<32x32xf32>, vector<8x32xf32> -> vector<8x32xf32>
      %25 = vector.broadcast %22 : vector<1x32xf32> to vector<8x32xf32>
      %26 = arith.addf %24, %25 : vector<8x32xf32>
      %cst_10 = arith.constant 0.000000e+00 : f32
      %27 = vector.broadcast %cst_10 : f32 to vector<8x32xf32>
      %28 = arith.maximumf %26, %27 : vector<8x32xf32>
      %29 = arith.index_cast %1 : i32 to index
      %c0_11 = arith.constant 0 : index
      %30 = vector.load %arg8[%29, %c0_11] : memref<8x32xf32, #tpu.memory_space<vmem>>, vector<8x32xf32>
      tpu.vector_store %arg8[%29, %c0_11], %28 {strides = array<i32>} : memref<8x32xf32, #tpu.memory_space<vmem>>, vector<8x32xf32>,
      %c2 = arith.constant 2 : index
      %c0_12 = arith.constant 0 : index
      %31 = vector.load %arg9[%c2, %c0_12] : memref<8x128xf32, #tpu.memory_space<vmem>>, vector<1x32xf32>
      %cst_13 = arith.constant dense<0.000000e+00> : vector<32xf32>
      %32 = vector.multi_reduction <add>, %28, %cst_13 [0] : vector<8x32xf32> to vector<32xf32>
      %33 = vector.shape_cast %32 : vector<32xf32> to vector<1x32xf32>
      %34 = arith.addf %31, %33 : vector<1x32xf32>
      %c2_14 = arith.constant 2 : index
      %c0_15 = arith.constant 0 : index
      %35 = vector.load %arg9[%c2_14, %c0_15] : memref<8x128xf32, #tpu.memory_space<vmem>>, vector<1x32xf32>
      tpu.vector_store %arg9[%c2_14, %c0_15], %34 {strides = array<i32>} : memref<8x128xf32, #tpu.memory_space<vmem>>, vector<1x32xf32>,
      %c3_16 = arith.constant 3 : index
      %c0_17 = arith.constant 0 : index
      %36 = vector.load %arg9[%c3_16, %c0_17] : memref<8x128xf32, #tpu.memory_space<vmem>>, vector<1x32xf32>
      %37 = arith.mulf %28, %28 : vector<8x32xf32>
      %cst_18 = arith.constant dense<0.000000e+00> : vector<32xf32>
      %38 = vector.multi_reduction <add>, %37, %cst_18 [0] : vector<8x32xf32> to vector<32xf32>
      %39 = vector.shape_cast %38 : vector<32xf32> to vector<1x32xf32>
      %40 = arith.addf %36, %39 : vector<1x32xf32>
      %c3_19 = arith.constant 3 : index
      %c0_20 = arith.constant 0 : index
      %41 = vector.load %arg9[%c3_19, %c0_20] : memref<8x128xf32, #tpu.memory_space<vmem>>, vector<1x32xf32>
      tpu.vector_store %arg9[%c3_19, %c0_20], %40 {strides = array<i32>} : memref<8x128xf32, #tpu.memory_space<vmem>>, vector<1x32xf32>,
    } else {
    }
    %c2_i32 = arith.constant 2 : i32
    %8 = arith.cmpi eq, %arg0, %c2_i32 : i32
    %9 = arith.extui %8 : i1 to i32
    %c0_i32_2 = arith.constant 0 : i32
    %10 = arith.cmpi ne, %9, %c0_i32_2 : i32
    scf.if %10 {
      %c0_i32_3 = arith.constant 0 : i32
      %11 = arith.cmpi eq, %arg1, %c0_i32_3 : i32
      %12 = arith.extui %11 : i1 to i32
      %c0_i32_4 = arith.constant 0 : i32
      %13 = arith.cmpi ne, %12, %c0_i32_4 : i32
      scf.if %13 {
        %c2 = arith.constant 2 : index
        %c0_13 = arith.constant 0 : index
        %33 = vector.load %arg9[%c2, %c0_13] : memref<8x128xf32, #tpu.memory_space<vmem>>, vector<1x128xf32>
        %cst_14 = arith.constant 1.250000e-01 : f32
        %34 = vector.broadcast %cst_14 : f32 to vector<1x128xf32>
        %35 = arith.mulf %33, %34 : vector<1x128xf32>
        %c3 = arith.constant 3 : index
        %c0_15 = arith.constant 0 : index
        %36 = vector.load %arg9[%c3, %c0_15] : memref<8x128xf32, #tpu.memory_space<vmem>>, vector<1x128xf32>
        %cst_16 = arith.constant 1.250000e-01 : f32
        %37 = vector.broadcast %cst_16 : f32 to vector<1x128xf32>
        %38 = arith.mulf %36, %37 : vector<1x128xf32>
        %39 = arith.mulf %35, %35 : vector<1x128xf32>
        %40 = arith.subf %38, %39 : vector<1x128xf32>
        %c4 = arith.constant 4 : index
        %c0_17 = arith.constant 0 : index
        %41 = vector.load %arg5[%c4, %c0_17] : memref<40x128xf32, #tpu.memory_space<vmem>>, vector<1x128xf32>
        %cst_18 = arith.constant 9.99999974E-6 : f32
        %42 = vector.broadcast %cst_18 : f32 to vector<1x128xf32>
        %43 = arith.addf %40, %42 : vector<1x128xf32>
        %44 = math.rsqrt %43 : vector<1x128xf32>
        %45 = arith.mulf %41, %44 : vector<1x128xf32>
        %c6_19 = arith.constant 6 : index
        %c0_20 = arith.constant 0 : index
        %46 = vector.load %arg9[%c6_19, %c0_20] : memref<8x128xf32, #tpu.memory_space<vmem>>, vector<1x128xf32>
        tpu.vector_store %arg9[%c6_19, %c0_20], %45 {strides = array<i32>} : memref<8x128xf32, #tpu.memory_space<vmem>>, vector<1x128xf32>,
        %c5 = arith.constant 5 : index
        %c0_21 = arith.constant 0 : index
        %47 = vector.load %arg5[%c5, %c0_21] : memref<40x128xf32, #tpu.memory_space<vmem>>, vector<1x128xf32>
        %48 = arith.mulf %35, %45 : vector<1x128xf32>
        %49 = arith.subf %47, %48 : vector<1x128xf32>
        %c7_22 = arith.constant 7 : index
        %c0_23 = arith.constant 0 : index
        %50 = vector.load %arg9[%c7_22, %c0_23] : memref<8x128xf32, #tpu.memory_space<vmem>>, vector<1x128xf32>
        tpu.vector_store %arg9[%c7_22, %c0_23], %49 {strides = array<i32>} : memref<8x128xf32, #tpu.memory_space<vmem>>, vector<1x128xf32>,
      } else {
      }
      %14 = arith.index_cast %1 : i32 to index
      %c0 = arith.constant 0 : index
      %15 = vector.load %arg8[%14, %c0] : memref<8x32xf32, #tpu.memory_space<vmem>>, vector<8x32xf32>
      %c6 = arith.constant 6 : index
      %c0_5 = arith.constant 0 : index
      %16 = vector.load %arg9[%c6, %c0_5] : memref<8x128xf32, #tpu.memory_space<vmem>>, vector<1x32xf32>
      %17 = vector.broadcast %16 : vector<1x32xf32> to vector<8x32xf32>
      %18 = arith.mulf %15, %17 : vector<8x32xf32>
      %c7 = arith.constant 7 : index
      %c0_6 = arith.constant 0 : index
      %19 = vector.load %arg9[%c7, %c0_6] : memref<8x128xf32, #tpu.memory_space<vmem>>, vector<1x32xf32>
      %20 = vector.broadcast %19 : vector<1x32xf32> to vector<8x32xf32>
      %21 = arith.addf %18, %20 : vector<8x32xf32>
      %c6_7 = arith.constant 6 : index
      %c0_8 = arith.constant 0 : index
      %22 = vector.load %arg5[%c6_7, %c0_8] : memref<40x128xf32, #tpu.memory_space<vmem>>, vector<1x1xf32>
      %c8 = arith.constant 8 : index
      %c0_9 = arith.constant 0 : index
      %23 = vector.load %arg5[%c8, %c0_9] : memref<40x128xf32, #tpu.memory_space<vmem>>, vector<32x1xf32>
      %24 = tpu.transpose %21, [1, 0] : vector<8x32xf32> -> vector<32x8xf32>
      %25 = vector.broadcast %23 : vector<32x1xf32> to vector<32x8xf32>
      %26 = arith.mulf %24, %25 : vector<32x8xf32>
      %cst = arith.constant dense<0.000000e+00> : vector<8xf32>
      %27 = vector.multi_reduction <add>, %26, %cst [0] : vector<32x8xf32> to vector<8xf32>
      %28 = vector.shape_cast %27 : vector<8xf32> to vector<1x8xf32>
      %29 = vector.broadcast %22 : vector<1x1xf32> to vector<1x8xf32>
      %30 = arith.addf %28, %29 : vector<1x8xf32>
      %31 = vector.shape_cast %30 : vector<1x8xf32> to vector<1x1x8xf32>
      %c0_10 = arith.constant 0 : index
      %c0_11 = arith.constant 0 : index
      %c0_12 = arith.constant 0 : index
      %32 = vector.load %arg6[%c0_10, %c0_11, %c0_12] : memref<1x1x128xf32, #tpu.memory_space<vmem>>, vector<1x1x8xf32>
      tpu.vector_store %arg6[%c0_10, %c0_11, %c0_12], %31 {strides = array<i32>} : memref<1x1x128xf32, #tpu.memory_space<vmem>>, vector<1x1x8xf32>,
    } else {
    }
    return
  }
  func.func @transform_0(%arg0: i32, %arg1: i32) -> (i32, i32) {
    %c0_i32 = arith.constant 0 : i32
    %c0_i32_0 = arith.constant 0 : i32
    return %arg1, %c0_i32 : i32, i32
  }
  func.func @transform_1(%arg0: i32, %arg1: i32) -> (i32, i32) {
    %c0_i32 = arith.constant 0 : i32
    %c0_i32_0 = arith.constant 0 : i32
    %c0_i32_1 = arith.constant 0 : i32
    return %c0_i32, %c0_i32_0 : i32, i32
  }
  func.func @transform_2(%arg0: i32, %arg1: i32) -> (i32, i32) {
    %c0_i32 = arith.constant 0 : i32
    %c0_i32_0 = arith.constant 0 : i32
    %c0_i32_1 = arith.constant 0 : i32
    return %c0_i32, %c0_i32_0 : i32, i32
  }
  func.func @transform_3(%arg0: i32, %arg1: i32) -> (i32, i32) {
    %c0_i32 = arith.constant 0 : i32
    %c0_i32_0 = arith.constant 0 : i32
    %c0_i32_1 = arith.constant 0 : i32
    return %c0_i32, %c0_i32_0 : i32, i32
  }
  func.func @transform_4(%arg0: i32, %arg1: i32) -> (i32, i32, i32) {
    %c0_i32 = arith.constant 0 : i32
    %c0_i32_0 = arith.constant 0 : i32
    %c0_i32_1 = arith.constant 0 : i32
    return %arg1, %c0_i32, %c0_i32_0 : i32, i32, i32
  }
}

</mosaic_0001>

<bundles_post_ra>
// kernel: tpu_custom_call.1
= control target key start
LH: loop header
LB: loop body
LE: loop exit
PB: predicated region body
PF: predicated region fallthrough
CT: control target
= control target key end

     0   :  { %9 = vsyncpa [#allocation6], 0  ;;  %s1285_s0 = inlined_call_operand.hbm [shape: f32[8,16], index: 0, kind: input, shape index: {}]   ;;  %s1286_s1 = inlined_call_operand.hbm [shape: f32[16,32], index: 1, kind: input, shape index: {}]   ;;  %s1287_s2 = inlined_call_operand.hbm [shape: f32[32,32], index: 2, kind: input, shape index: {}]   ;;  %s1288_s3 = inlined_call_operand.hbm [shape: f32[40,128], index: 3, kind: input, shape index: {}]   ;;  %s1289_s4 = inlined_call_operand.hbm [shape: f32[1,1,128], index: 4, kind: output, shape index: {}]  }
   0x1   :  { %10 = vsyncpa [#allocation9], 0 }
   0x2   :  { %11 = vsyncpa [#allocation12], 0 }
   0x3   :  { %12 = vsyncpa [#allocation7], 0  ;;  %s1092_s15 = smov 0   ;;  %s1094_s16 = smov 0  }
   0x4   :  { %s1096_s17 = smov 0  }
   0x5 LB: > { %s1053_s18 = smov [#allocation8]   ;;  %s726_s20 = sadd.s32 4294967295, %s1051_s17   ;;  %s1051_s17 = sphi %s1096_s17, %s18_s17   ;;  %s1047_s16 = sphi %s1094_s16, %s1302_s16   ;;  %s1043_s15 = sphi %s1092_s15, %s1301_s15  }
   0x6   : > { %s175_s19 = sshll.u32 %s1053_s18, 4  ;;  %p727_p0 = scmp.ge.s32.totalorder %s1051_s17, 1  ;;  %s1116_s19 = int_to_ptr.vmem [resolvable:$true] %s175_s19 }
   0x7   : > { %p150_p1 = scmp.lt.s32.totalorder %s1051_s17, 4  ;;  %p1112_p2 = scmp.eq.s32.totalorder %s726_s20, 0 }
   0x8   : > { %s30_s24 = sadd.s32 1, %s1047_s16  ;;  %s1054_s26 = smov [#allocation5]  }
   0x9   : > { %s1293_s21 = scalar_select %p1112_p2, 1, 0 }
   0xa   : > { %p1118_p3 = pnand %p727_p0, %p150_p1  ;;  %p1131_p6 = scmp.ge.s32.totalorder %s30_s24, 3 }
   0xb   : > { %s165_s27 = sshll.u32 %s1054_s26, 4  ;;  %s875_s30 = scalar_lea.hbm %s1286_s1, 256  ;;  %s166_s27 = int_to_ptr.vmem [resolvable:$true] %s165_s27 }
   0xc   : > { %s1294_s22 = scalar_select %p1118_p3, 1, 0 }
   0xd   : > { %p807_p4 = pneg %p1118_p3  ;;  %p876_p7 = scmp.ne.s32.totalorder %s1286_s1, %s875_s30 }
   0xe   : > { %p882_p11 = scmp.lt.u32.totalorder %s875_s30, %s1286_s1 }
   0xf   : > { %p1126_p5 = pnand %p1112_p2, %p807_p4 }
  0x11   : > { %p1143_p8 = pneg %p1126_p5 }
  0x13   : > { %p878_p9 = pnand %p1143_p8, %p876_p7 }
  0x15   : > { %p879_p10 = pneg %p878_p9 }
  0x17   : > { %p884_p12 = pnand %p882_p11, %p879_p10 }
  0x19   : > { %887 = shalt.err (!%p884_p12)
}
  0x1a   : > { %s888_s10 = scalar_lea.vmem %s1116_s19, 256  ;;  %p896_p4 = scmp.lt.s32.totalorder %s1116_s19, %s1116_s19 }
  0x1b   : > { %p889_p13 = scmp.ne.s32.totalorder %s1116_s19, %s888_s10  ;;  %p897_p2 = scmp.lt.s32.totalorder %s888_s10, %s888_s10 }
  0x1d   : > { %p891_p0 = pnand %p889_p13, %p1143_p8  ;;  %p898_p7 = por %p897_p2, %p896_p4 }
  0x1f   : > { %p892_p1 = pneg %p891_p0 }
  0x21   : > { %p899_p9 = pnand %p898_p7, %p892_p1 }
  0x23   : > { %902 = shalt.err (!%p899_p9)
}
  0x24   : > { %s1055_s11 = smov 128   ;;  %s1056_s12 = smov 8  }
  0x25   : > { %813 = dma.hbm_to_vmem [thread:$0]  (!%p1126_p5), %s1286_s1, 256, %s1116_s19, [#allocation9], %s1055_s11, %s1055_s11, %s1056_s12  }
  0x26   : > { %s1304_s24 = smov (%p1131_p6, %s30_s24), 0  ;;  %s903_s28 = scalar_lea.hbm %s1285_s0, 128 }
  0x27   : > { %p904_p2 = scmp.ne.s32.totalorder %s1285_s0, %s903_s28  ;;  %p910_p12 = scmp.lt.u32.totalorder %s903_s28, %s1285_s0 }
  0x29   : > { %p906_p10 = pnand %p904_p2, %p1143_p8 }
  0x2b   : > { %p907_p11 = pneg %p906_p10 }
  0x2d   : > { %p912_p13 = pnand %p910_p12, %p907_p11 }
  0x2f   : > { %915 = shalt.err (!%p912_p13)
}
  0x30   : > { %s916_s19 = scalar_lea.vmem %s166_s27, 128  ;;  %p924_p4 = scmp.lt.s32.totalorder %s166_s27, %s166_s27 }
  0x31   : > { %p917_p6 = scmp.ne.s32.totalorder %s166_s27, %s916_s19  ;;  %p925_p7 = scmp.lt.s32.totalorder %s916_s19, %s916_s19 }
  0x33   : > { %p919_p0 = pnand %p917_p6, %p1143_p8  ;;  %p926_p9 = por %p925_p7, %p924_p4 }
  0x35   : > { %p920_p1 = pneg %p919_p0 }
  0x37   : > { %p927_p3 = pnand %p926_p9, %p920_p1 }
  0x39   : > { %930 = shalt.err (!%p927_p3)
}
  0x3a   : > { %810 = dma.hbm_to_vmem [thread:$0]  (!%p1126_p5), %s1285_s0, 128, %s166_s27, [#allocation6]  }
  0x3b   : > { %s1057_s9 = smov [#allocation10]   ;;  %s1058_s13 = smov [#allocation11]  }
  0x3c   : > { %s188_s10 = sshll.u32 %s1057_s9, 4  ;;  %s201_s14 = sshll.u32 %s1058_s13, 4  ;;  %s189_s10 = int_to_ptr.vmem [resolvable:$true] %s188_s10  ;;  %s202_s14 = int_to_ptr.vmem [resolvable:$true] %s201_s14 }
  0x3d   : > { %s931_s28 = scalar_lea.hbm %s1287_s2, 512 }
  0x3e   : > { %p932_p3 = scmp.ne.s32.totalorder %s1287_s2, %s931_s28  ;;  %p938_p11 = scmp.lt.u32.totalorder %s931_s28, %s1287_s2 }
  0x40   : > { %p934_p2 = pnand %p932_p3, %p1143_p8 }
  0x42   : > { %p935_p10 = pneg %p934_p2 }
  0x44   : > { %p940_p12 = pnand %p938_p11, %p935_p10 }
  0x46   : > { %943 = shalt.err (!%p940_p12)
}
  0x47   : > { %s944_s27 = scalar_lea.vmem %s189_s10, 512  ;;  %p952_p1 = scmp.lt.s32.totalorder %s189_s10, %s189_s10 }
  0x48   : > { %p945_p13 = scmp.ne.s32.totalorder %s189_s10, %s944_s27  ;;  %p953_p4 = scmp.lt.s32.totalorder %s944_s27, %s944_s27 }
  0x4a   : > { %p947_p6 = pnand %p945_p13, %p1143_p8  ;;  %p954_p7 = por %p953_p4, %p952_p1 }
  0x4c   : > { %p948_p0 = pneg %p947_p6 }
  0x4e   : > { %p955_p9 = pnand %p954_p7, %p948_p0 }
  0x50   : > { %958 = shalt.err (!%p955_p9)
}
  0x51   : > { %816 = dma.hbm_to_vmem [thread:$0]  (!%p1126_p5), %s1287_s2, 512, %s189_s10, [#allocation9], %s1055_s11, %s1055_s11, %s1056_s12  }
  0x52   : > { %s959_s13 = scalar_lea.hbm %s1288_s3, 640 }
  0x53   : > { %p960_p3 = scmp.ne.s32.totalorder %s1288_s3, %s959_s13  ;;  %p966_p11 = scmp.lt.u32.totalorder %s959_s13, %s1288_s3 }
  0x55   : > { %p962_p2 = pnand %p960_p3, %p1143_p8 }
  0x57   : > { %p963_p10 = pneg %p962_p2 }
  0x59   : > { %p968_p12 = pnand %p966_p11, %p963_p10 }
  0x5b   : > { %971 = shalt.err (!%p968_p12)
}
  0x5c   : > { %s972_s30 = scalar_lea.vmem %s202_s14, 640  ;;  %p980_p1 = scmp.lt.s32.totalorder %s202_s14, %s202_s14 }
  0x5d   : > { %p973_p13 = scmp.ne.s32.totalorder %s202_s14, %s972_s30  ;;  %p981_p4 = scmp.lt.s32.totalorder %s972_s30, %s972_s30 }
  0x5f   : > { %p975_p6 = pnand %p973_p13, %p1143_p8  ;;  %p982_p7 = por %p981_p4, %p980_p1 }
  0x61   : > { %p976_p0 = pneg %p975_p6 }
  0x63   : > { %p983_p9 = pnand %p982_p7, %p976_p0 }
  0x65   : > { %986 = shalt.err (!%p983_p9)
}
  0x66   : > { %819 = dma.hbm_to_vmem [thread:$0]  (!%p1126_p5), %s1288_s3, 640, %s202_s14, [#allocation12], %s1055_s11, %s1055_s11, %s1056_s12  }
  0x67   : > { %p1298_p3 = scmp.ne.s32.totalorder %s1294_s22, 0 }
  0x68   : > { %p1299_p8 = scmp.ne.s32.totalorder (!%p1298_p3), %s1293_s21, 0 }
  0x69   : > { %217 = sbr.rel (%p1298_p3) target bundleno = 866 (0x362), region = 36 }
  0x70   : > { %1026 = dma.done.wait (%p1299_p8), [#allocation6], 128  }
  0x71   : > { %1028 = vsyncadd (%p1299_p8), [#allocation6], 4294967168 }
  0x72   : > { %1030 = dma.done.wait (%p1299_p8), [#allocation9], 768  }
  0x73   : > { %1032 = vsyncadd (%p1299_p8), [#allocation9], 4294966528 }
  0x74   : > { %1034 = dma.done.wait (%p1299_p8), [#allocation12], 640  }
  0x75   : > { %1036 = vsyncadd (%p1299_p8), [#allocation12], 4294966656  ;;  %p737_p5 = scmp.ne.s32.totalorder %s1043_s15, 0 }
  0x76   : > { %v257_v0 = vld [vmem:[#allocation8] sm:$0xff] (!%p737_p5)  ;;  %v258_v1 = vld [vmem:[#allocation8 + $0x8] sm:$0xff] (!%p737_p5)  ;;  %v1059_v2 = vmov (!%p737_p5), 0.0|0.0   ;;  %v1060_v4 = vmov (!%p737_p5), 0.0   ;;  %vm1061_vm0 = vmmov (!%p737_p5), 0   ;;  %v256_v5 = vld [vmem:[#allocation5] sm:$0xff] (!%p737_p5) }
  0x77   : > { %249 = sbr.rel (%p737_p5) target bundleno = 358 (0x166), region = 56  ;;  %778 = vmatprep.subr.bf16.mxu0 (!%p737_p5), %v1059_v2  ;;  %v779_v3 = vpack.c.bf16 (!%p737_p5), %v258_v1, %v257_v0  ;;  %254 = vst [vmem:[#allocation4] sm:$0xff] (!%p737_p5), %v1060_v4  ;;  %764 = vmatprep.mubr.msk.f32.mxu0 (!%p737_p5), %vm1061_vm0, %v1060_v4  ;;  %vm263_vm1 = vcmask (!%p737_p5), 130048   ;;  %v738_v6 = vld [vmem:[#allocation11] ss:$0 sm:$0xff] (!%p737_p5)  ;;  %vm339_vm2 = vcmask (!%p737_p5), 261120  }
  0x78   : > { %vm350_vm3 = vcmask (!%p737_p5), 253952  }
  0x79   : > { %780 = vmatpush3.bf16.msra.mxu0 (!%p737_p5), %v779_v3 }
  0x7c   : > { %765 = vmatmul.mubr.msk.f32.vlgmr.msra.gmra.mrb[0].mxu0 (!%p737_p5), %vm263_vm1, %v256_v5 }
  0x7e   : > { %v341_v23 = vld [vmem:[#allocation4] sm:$0x1]  ;;  %v352_v26 = vld [vmem:[#allocation4 + $0x1] sm:$0x1] }
 0x14f   : > { %v333_v7 = vpop.f32.mrb[0].mxu0 }
 0x150   : > { %v334_v8 = vadd.f32 %v738_v6, %v333_v7  ;;  %v766_v9 = vpop.f32.mrb[1].mxu0 }
 0x152   : > { %v337_v10 = vmax.f32 %v334_v8, 0.0 }
 0x154   : > { %340 = vst.msk [vmem:[#allocation2] sm:$0xff] %vm339_vm2, %v337_v10  ;;  %v342_v11 = vsel %vm339_vm2, %v337_v10, 0.0  ;;  %v353_v12 = vmul.f32 %v337_v10, %v337_v10 }
 0x155   : > { %v343_v13 = vrot.slane %v342_v11, 4 }
 0x156   : > { %v354_v14 = vsel %vm339_vm2, %v353_v12, 0.0 }
 0x157   : > { %v344_v15 = vadd.f32 %v343_v13, %v342_v11  ;;  %v355_v16 = vrot.slane %v354_v14, 4 }
 0x159   : > { %v345_v17 = vrot.slane %v344_v15, 2  ;;  %v356_v18 = vadd.f32 %v355_v16, %v354_v14 }
 0x15b   : > { %v346_v19 = vadd.f32 %v345_v17, %v344_v15  ;;  %v357_v20 = vrot.slane %v356_v18, 2 }
 0x15d   : > { %v347_v21 = vrot.slane %v346_v19, 1  ;;  %v358_v22 = vadd.f32 %v357_v20, %v356_v18 }
 0x15f   : > { %v348_v24 = vadd.f32 %v347_v21, %v346_v19  ;;  %v359_v25 = vrot.slane %v358_v22, 1 }
 0x161   : > { %v349_v27 = vadd.f32 %v348_v24, %v341_v23  ;;  %v360_v28 = vadd.f32 %v359_v25, %v358_v22 }
 0x163   : > { %351 = vst.msk [vmem:[#allocation4] sm:$0x1] %vm350_vm3, %v349_v27  ;;  %v361_v29 = vadd.f32 %v360_v28, %v352_v26 }
 0x165   : > { %362 = vst.msk [vmem:[#allocation4 + $0x1] sm:$0x1] %vm350_vm3, %v361_v29 }
 0x166 PF: > { %p740_p2 = scmp.ne.s32.totalorder %s1043_s15, 1 }
 0x167   : > { %v401_v30 = vld [vmem:[#allocation10] sm:$0xff] (!%p740_p2)  ;;  %v402_v31 = vld [vmem:[#allocation10 + $0x8] sm:$0xff] (!%p740_p2)  ;;  %v403_v32 = vld [vmem:[#allocation10 + $0x10] sm:$0xff] (!%p740_p2)  ;;  %v1062_v33 = vmov (!%p740_p2), 0.0|0.0   ;;  %vm1063_vm4 = vmmov (!%p740_p2), 0   ;;  %v1064_v36 = vmov (!%p740_p2), 0.0  }
 0x168   : > { %366 = sbr.rel (%p740_p2) target bundleno = 632 (0x278), region = 64  ;;  %781 = vmatprep.subr.bf16.mxu0 (!%p740_p2), %v1062_v33  ;;  %v782_v34 = vpack.c.bf16 (!%p740_p2), %v402_v31, %v401_v30  ;;  %v404_v35 = vld [vmem:[#allocation10 + $0x18] sm:$0xff] (!%p740_p2)  ;;  %775 = vmatprep.mubr.msk.f32.mxu0 (!%p740_p2), %vm1063_vm4, %v1064_v36  ;;  %v377_v45 = vld [vmem:[#allocation11 + $0x1] sm:$0x1] (!%p740_p2)  ;;  %v382_v48 = vld [vmem:[#allocation11 + $0x2] sm:$0x1] (!%p740_p2) }
 0x169   : > { %v785_v41 = vpack.c.bf16 (!%p740_p2), %v404_v35, %v403_v32  ;;  %v387_v51 = vld [vmem:[#allocation2] sm:$0xff] (!%p740_p2)  ;;  %vm409_vm5 = vcmask (!%p740_p2), 261120   ;;  %v743_v56 = vld [vmem:[#allocation11 + $0x3] ss:$0 sm:$0xff] (!%p740_p2)  ;;  %v486_v9 = vld [vmem:[#allocation4 + $0x2] sm:$0x1] (!%p740_p2) }
 0x16a   : > { %v371_v37 = vld [vmem:[#allocation4] sm:$0x1] (!%p740_p2)  ;;  %783 = vmatpush3.bf16.msra.mxu0 (!%p740_p2), %v782_v34  ;;  %vm495_vm6 = vcmask (!%p740_p2), 253952   ;;  %v497_v12 = vld [vmem:[#allocation4 + $0x3] sm:$0x1] (!%p740_p2) }
 0x16b   : > { %v372_v39 = vmul.f32 (!%p740_p2), 0.125, %v371_v37  ;;  %784 = vmatprep.subr.bf16.mxu0 (!%p740_p2), %v1062_v33 }
 0x16c   : > { %v373_v38 = vld [vmem:[#allocation4 + $0x1] sm:$0x1] (!%p740_p2) }
 0x16d   : > { %v374_v40 = vmul.f32 (!%p740_p2), 0.125, %v373_v38  ;;  %v375_v42 = vmul.f32 (!%p740_p2), %v372_v39, %v372_v39 }
 0x16e   : > { %786 = vmatpush3.bf16.msra.mxu0 (!%p740_p2), %v785_v41 }
 0x16f   : > { %v376_v43 = vsub.f32 %v374_v40, %v375_v42 }
 0x171   : > { %v378_v44 = vadd.f32 1e-05, %v376_v43 }
 0x173   : > { %869 = vrsqrt.f32 %v378_v44 }
 0x17d   : > { %v870_v46 = vpop.eup %869 }
 0x17e   : > { %v380_v47 = vmul.f32 %v870_v46, %v377_v45 }
 0x180   : > { %381 = vst [vmem:[#allocation4 + $0x4] sm:$0x1] %v380_v47  ;;  %v383_v49 = vmul.f32 %v380_v47, %v372_v39 }
 0x182   : > { %v384_v50 = vsub.f32 %v382_v48, %v383_v49 }
 0x184   : > { %385 = vst [vmem:[#allocation4 + $0x5] sm:$0x1] %v384_v50 }
 0x187   : > { %v741_v52 = vld [vmem:[#allocation4 + $0x4] ss:$0 sm:$0xff] }
 0x188   : > { %v393_v53 = vmul.f32 %v741_v52, %v387_v51 }
 0x18b   : > { %v742_v54 = vld [vmem:[#allocation4 + $0x5] ss:$0 sm:$0xff] }
 0x18c   : > { %v399_v55 = vadd.f32 %v742_v54, %v393_v53 }
 0x18e   : > { %776 = vmatmul.mubr.msk.f32.vlgmr.msra.gmra.mrb[0].mxu0 %vm409_vm5, %v399_v55 }
 0x261   : > { %v479_v57 = vpop.f32.mrb[0].mxu0 }
 0x262   : > { %v480_v58 = vadd.f32 %v743_v56, %v479_v57  ;;  %v777_v59 = vpop.f32.mrb[1].mxu0 }
 0x264   : > { %v483_v60 = vmax.f32 %v480_v58, 0.0 }
 0x266   : > { %485 = vst.msk [vmem:[#allocation3] sm:$0xff] %vm409_vm5, %v483_v60  ;;  %v487_v61 = vsel %vm409_vm5, %v483_v60, 0.0  ;;  %v498_v62 = vmul.f32 %v483_v60, %v483_v60 }
 0x267   : > { %v488_v63 = vrot.slane %v487_v61, 4 }
 0x268   : > { %v499_v0 = vsel %vm409_vm5, %v498_v62, 0.0 }
 0x269   : > { %v489_v1 = vadd.f32 %v488_v63, %v487_v61  ;;  %v500_v2 = vrot.slane %v499_v0, 4 }
 0x26b   : > { %v490_v3 = vrot.slane %v489_v1, 2  ;;  %v501_v4 = vadd.f32 %v500_v2, %v499_v0 }
 0x26d   : > { %v491_v5 = vadd.f32 %v490_v3, %v489_v1  ;;  %v502_v6 = vrot.slane %v501_v4, 2 }
 0x26f   : > { %v492_v7 = vrot.slane %v491_v5, 1  ;;  %v503_v8 = vadd.f32 %v502_v6, %v501_v4 }
 0x271   : > { %v493_v10 = vadd.f32 %v492_v7, %v491_v5  ;;  %v504_v11 = vrot.slane %v503_v8, 1 }
 0x273   : > { %v494_v13 = vadd.f32 %v493_v10, %v486_v9  ;;  %v505_v14 = vadd.f32 %v504_v11, %v503_v8 }
 0x275   : > { %496 = vst.msk [vmem:[#allocation4 + $0x2] sm:$0x1] %vm495_vm6, %v494_v13  ;;  %v506_v15 = vadd.f32 %v505_v14, %v497_v12 }
 0x277   : > { %507 = vst.msk [vmem:[#allocation4 + $0x3] sm:$0x1] %vm495_vm6, %v506_v15 }
 0x278 PF: > { %p745_p10 = scmp.ne.s32.totalorder %s1043_s15, 2 }
 0x279   : > { %v548_v16 = vld [vmem:[#allocation11 + $0x18] sm:$0xff] (!%p745_p10)  ;;  %v546_v17 = vld [vmem:[#allocation11 + $0x8] sm:$0xff] (!%p745_p10)  ;;  %v1065_v18 = vmov (!%p745_p10), 0   ;;  %v549_v23 = vld [vmem:[#allocation11 + $0x20] sm:$0xff] (!%p745_p10)  ;;  %vm606_vm7 = vcmask (!%p745_p10), 64512   ;;  %vm626_vm8 = vcmask (!%p745_p10), 57344  }
 0x27a   : > { %511 = sbr.rel (%p745_p10) target bundleno = 841 (0x349), region = 72  ;;  %872 = vset.pattern.permute.xlu1 (!%p745_p10), %v1065_v18  ;;  %871 = vset.pattern.permute.xlu0 (!%p745_p10), %v1065_v18  ;;  %v547_v24 = vld [vmem:[#allocation11 + $0x10] sm:$0xff] (!%p745_p10)  ;;  %v545_v27 = vld [vmem:[#allocation11 + $0x6] sm:$0x1] (!%p745_p10)  ;;  %v522_v29 = vld [vmem:[#allocation11 + $0x4] sm:$0x1] (!%p745_p10) }
 0x27b   : > { %594 = vperm.xlu1 (!%p745_p10), %872, %v548_v16   ;;  %584 = vperm.xlu0 (!%p745_p10), %871, %v546_v17   ;;  %v527_v32 = vld [vmem:[#allocation11 + $0x5] sm:$0x1] (!%p745_p10)  ;;  %v532_v35 = vld [vmem:[#allocation3] sm:$0xff] (!%p745_p10) }
 0x27c   : > { %v516_v19 = vld [vmem:[#allocation4 + $0x2] sm:$0x1] (!%p745_p10) }
 0x27d   : > { %v517_v21 = vmul.f32 (!%p745_p10), 0.125, %v516_v19 }
 0x27e   : > { %v518_v20 = vld [vmem:[#allocation4 + $0x3] sm:$0x1] (!%p745_p10) }
 0x27f   : > { %v519_v22 = vmul.f32 (!%p745_p10), 0.125, %v518_v20  ;;  %v520_v25 = vmul.f32 (!%p745_p10), %v517_v21, %v517_v21  ;;  %599 = vperm.xlu1 (!%p745_p10), %872, %v549_v23   ;;  %589 = vperm.xlu0 (!%p745_p10), %871, %v547_v24  }
 0x281   : > { %v521_v26 = vsub.f32 %v519_v22, %v520_v25 }
 0x283   : > { %v523_v28 = vadd.f32 1e-05, %v521_v26  ;;  %622 = vperm.xlu0 %871, %v545_v27  }
 0x285   : > { %873 = vrsqrt.f32 %v523_v28 }
 0x28f   : > { %v874_v30 = vpop.eup %873 }
 0x290   : > { %v525_v31 = vmul.f32 %v874_v30, %v522_v29 }
 0x292   : > { %526 = vst [vmem:[#allocation4 + $0x6] sm:$0x1] %v525_v31  ;;  %v528_v33 = vmul.f32 %v525_v31, %v517_v21 }
 0x294   : > { %v529_v34 = vsub.f32 %v527_v32, %v528_v33 }
 0x296   : > { %530 = vst [vmem:[#allocation4 + $0x7] sm:$0x1] %v529_v34 }
 0x299   : > { %v746_v36 = vld [vmem:[#allocation4 + $0x6] ss:$0 sm:$0xff] }
 0x29a   : > { %v538_v37 = vmul.f32 %v746_v36, %v532_v35 }
 0x29d   : > { %v747_v38 = vld [vmem:[#allocation4 + $0x7] ss:$0 sm:$0xff] }
 0x29e   : > { %v544_v39 = vadd.f32 %v747_v38, %v538_v37 }
 0x2a8   : > { %550 = vxpose.xlu1.b32.start.end [1/1] (short) (narrow) %v544_v39, 32 }
 0x2fa   : > { %v595_v40 = vpop.permute.xlu1 %594  ;;  %v585_v42 = vpop.permute.xlu0 %584 }
 0x2fe   : > { %v600_v41 = vpop.permute.xlu1 %599  ;;  %v590_v44 = vpop.permute.xlu0 %589 }
 0x302   : > { %v623_v1 = vpop.permute.xlu0 %622 }
 0x328   : > { %v566_v43 = vpop.trf.xlu1 }
 0x329   : > { %v602_v47 = vmul.f32 %v585_v42, %v566_v43 }
 0x32b   : > { %v607_v51 = vsel %vm606_vm7, %v602_v47, 0.0 }
 0x32c   : > { %v567_v45 = vpop.trf.xlu1 }
 0x32d   : > { %v603_v46 = vmul.f32 %v590_v44, %v567_v45 }
 0x32f   : > { %v608_v49 = vsel %vm606_vm7, %v603_v46, 0.0 }
 0x330   : > { %v568_v48 = vpop.trf.xlu1  ;;  %v609_v53 = vadd.f32 %v608_v49, %v607_v51 }
 0x331   : > { %v604_v50 = vmul.f32 %v595_v40, %v568_v48 }
 0x333   : > { %v610_v52 = vsel %vm606_vm7, %v604_v50, 0.0 }
 0x334   : > { %v569_v54 = vpop.trf.xlu1  ;;  %v611_v56 = vadd.f32 %v610_v52, %v609_v53 }
 0x335   : > { %v605_v55 = vmul.f32 %v600_v41, %v569_v54 }
 0x337   : > { %v612_v57 = vsel %vm606_vm7, %v605_v55, 0.0 }
 0x338   : > { %v613_v58 = vadd.f32 %v612_v57, %v611_v56 }
 0x33a   : > { %v614_v59 = vrot.slane %v613_v58, 4 }
 0x33c   : > { %v615_v60 = vadd.f32 %v614_v59, %v613_v58 }
 0x33e   : > { %v616_v61 = vrot.slane %v615_v60, 2 }
 0x340   : > { %v617_v62 = vadd.f32 %v616_v61, %v615_v60 }
 0x342   : > { %v618_v63 = vrot.slane %v617_v62, 1 }
 0x344   : > { %v619_v0 = vadd.f32 %v618_v63, %v617_v62 }
 0x346   : > { %v625_v2 = vadd.f32 %v623_v1, %v619_v0 }
 0x348   : > { %627 = vst.msk [vmem:[#allocation13] sm:$0x1] %vm626_vm8, %v625_v2 }
 0x349 PF: > { %p1250_p11 = scmp.eq.s32.totalorder %s726_s20, 2  ;;  %s1066_s21 = smov [#allocation13]  }
 0x34a   : > { %s637_s22 = sshll.u32 %s1066_s21, 4  ;;  %s638_s22 = int_to_ptr.vmem [resolvable:$true] %s637_s22 }
 0x34b   : > { %s987_s23 = scalar_lea.vmem %s638_s22, 16  ;;  %s993_s7 = scalar_lea.vmem %s638_s22, 32 }
 0x34c   : > { %p988_p12 = scmp.ne.s32.totalorder %s638_s22, %s987_s23  ;;  %p994_p0 = scmp.lt.s32.totalorder %s638_s22, %s638_s22 }
 0x34d   : > { %p995_p1 = scmp.lt.s32.totalorder %s993_s7, %s987_s23 }
 0x34e   : > { %p989_p13 = pnand %p988_p12, %p1250_p11 }
 0x34f   : > { %p996_p4 = por %p995_p1, %p994_p0 }
 0x350   : > { %p990_p6 = pneg %p989_p13 }
 0x352   : > { %p997_p7 = pnand %p996_p4, %p990_p6 }
 0x354   : > { %1000 = shalt.err (!%p997_p7)
}
 0x355   : > { %s1001_s12 = scalar_lea.hbm %s1289_s4, 16 }
 0x356   : > { %p1002_p9 = scmp.ne.s32.totalorder %s1289_s4, %s1001_s12  ;;  %p1007_p5 = scmp.lt.u32.totalorder %s1001_s12, %s1289_s4 }
 0x358   : > { %p1003_p3 = pnand %p1002_p9, %p1250_p11 }
 0x35a   : > { %p1004_p8 = pneg %p1003_p3 }
 0x35c   : > { %p1009_p2 = pnand %p1007_p5, %p1004_p8 }
 0x35e   : > { %1012 = shalt.err (!%p1009_p2)
}
 0x35f   : > { %804 = dma.vmem_to_hbm [thread:$0]  (%p1250_p11), %s638_s22, 16, %s1289_s4, [#allocation7]  }
 0x360   : > { %1038 = dma.done.wait (%p1250_p11), [#allocation7], 16  }
 0x361   : > { %1040 = vsyncadd (%p1250_p11), [#allocation7], 4294967280 }
 0x362 PF: > { %s18_s17 = sadd.s32 1, %s1051_s17   ;;  %s1301_s15 = smov %s1047_s16 }
 0x363   : > { %p15_p10 = scmp.ge.s32.totalorder %s18_s17, 5   ;;  %s1302_s16 = smov %s1304_s24 }
 0x365   :  { %17 = sbr.rel (!%p15_p10) target bundleno = 5 (0x5), region = 107 }
 0x36c   :  { %650 = vsyncpa [#allocation6], 1 }
 0x36d   :  { %652 = vsyncpa [#allocation6 + $0x1], 1 }
 0x36e   :  { %653 = vsyncpa [#allocation9], 1 }
 0x36f   :  { %654 = vsyncpa [#allocation12], 1 }
 0x370   :  { %655 = vsyncpa [#allocation7], 1 }
 0x371   :  { %657 = vsyncpa [#allocation7 + $0x1], 1 }

</bundles_post_ra>
